<compile_context>
chip_gen: v5e
topology: v5e:2x2
jax: 0.10.0
libtpu: 0.0.40
codegen_flags: <defaults>
</compile_context>

<pallas_src>
import functools

import jax
import jax.numpy as jnp
from jax.experimental import pallas as pl
from jax.experimental.pallas import tpu as pltpu


def _round_up(n, m):
    return ((n + m - 1) // m) * m


def _physical_vmem_bytes():
    try:
        return int(pltpu.get_tpu_info().vmem_capacity_bytes)
    except Exception:
        return 64 * 1024 * 1024  # conservative (v7x-sized) fallback


def _pick_tn(hp, max_w_bytes):
    """Largest multiple-of-128 divisor of hp whose (hp, tn) bf16 weight slab fits."""
    d = hp
    while d > 128:
        if hp % d == 0 and hp * d * 2 <= max_w_bytes:
            return d
        d -= 128
    return 128


def _sublayer_connection_kernel(x_ref, a2_ref, b2_ref, w_ref, bias_ref, o_ref, *,
                                eps, h_true):
    # x_ref: (TM, Hp) f32 row tile; resident across the column-grid axis.
    x = x_ref[...]

    # --- LayerNorm stats straight from x: two independent XLU reductions.
    # Padded columns are zero and we divide by the true H, so padding is exact.
    mean = jnp.sum(x, axis=-1, keepdims=True) * (1.0 / h_true)
    sumsq = jnp.sum(x * x, axis=-1, keepdims=True)
    var = (sumsq - h_true * mean * mean) * (1.0 / (h_true - 1))  # unbiased, torch.std
    std = jnp.sqrt(jnp.maximum(var, 0.0))                        # clamp round-off
    inv = pl.reciprocal(std + eps, approx=True)                  # EUP slot, eps on std
    normed = a2_ref[...] * ((x - mean) * inv) + b2_ref[...]

    # --- sublayer: Linear column tile on the MXU, bf16 operands, f32 accumulation.
    y = jnp.dot(normed.astype(jnp.bfloat16), w_ref[...],
                preferred_element_type=jnp.float32) + bias_ref[...]

    # --- dropout (eval mode => identity) + residual add in f32; cast only at store.
    tn = o_ref.shape[-1]
    if tn == x_ref.shape[-1]:                 # single column tile: no slice needed
        x_cols = x
    else:
        col0 = pl.multiple_of(pl.program_id(1) * tn, tn)
        x_cols = x_ref[:, pl.ds(col0, tn)]
    o_ref[...] = (x_cols + y).astype(o_ref.dtype)


def sublayer_connection(x, a2, b2, w, bias, *, eps=1e-6, tm=512, out_dtype=None):
    """out = x + Linear(LayerNorm(x))  (eval-mode dropout == identity).

    x: (B, S, H) float32. LayerNorm matches the Annotated-Transformer variant:
    unbiased std over the last axis, eps added to std (not inside the sqrt).
    """
    B, S, H = x.shape
    assert H > 1, "unbiased std (N-1) is degenerate for hidden size 1"
    assert x.dtype == jnp.float32, "row/sublane tiling below assumes f32 input"
    out_dtype = x.dtype if out_dtype is None else out_dtype
    out_size = jnp.dtype(out_dtype).itemsize
    R = B * S

    # ---- lane-dense layout: pad hidden to a multiple of 128 ----------------
    # Zero column padding is exact: padded lanes contribute 0 to the sums, the kernel
    # divides by the true H, padded a2/b2/w/bias are zero, and padded output columns
    # come out as exact zeros which are sliced off below.
    Hp = _round_up(H, 128)
    x2 = x.reshape(R, H)
    if Hp != H:
        x2 = jnp.pad(x2, ((0, 0), (0, Hp - H)))
        a2 = jnp.pad(a2, (0, Hp - H))
        b2 = jnp.pad(b2, (0, Hp - H))
        bias = jnp.pad(bias, (0, Hp - H))
        w = jnp.pad(w, ((0, Hp - H), (0, Hp - H)))

    # ---- VMEM budget: physical capacity with ~10% headroom ------------------
    vmem_cap = int(_physical_vmem_bytes() * 0.9)   # ~57 MiB v7x, ~115 MiB v5e/v6e

    # ---- weight column tile: keep the resident bf16 weight slab bounded -----
    tn = _pick_tn(Hp, max_w_bytes=vmem_cap // 3)
    grid_n = Hp // tn
    w_bufs = 1 if grid_n == 1 else 2               # grid-invariant weight -> 1 buffer

    # ---- row tile: fill remaining VMEM with the f32 x / out double buffers ---
    fixed = w_bufs * Hp * tn * 2 + 2 * Hp * 4 + w_bufs * tn * 4
    per_row = 2 * Hp * 4 + 2 * tn * out_size + Hp * 6 + tn * 4   # pipelining + temps
    tm_cap = max(8, ((vmem_cap - fixed) // max(per_row, 1)) // 8 * 8)
    tm_eff = max(8, min(_round_up(tm, 8), tm_cap, _round_up(R, 8)))

    grid_m = pl.cdiv(R, tm_eff)
    if grid_m < 2 and R > 8:
        # Keep both v7x TensorCores busy: at least two "parallel" row steps.
        tm_eff = _round_up(pl.cdiv(R, 2), 8)
        grid_m = pl.cdiv(R, tm_eff)
    r_pad = grid_m * tm_eff
    if r_pad != R:
        x2 = jnp.pad(x2, ((0, r_pad - R), (0, 0)))  # zero rows: finite, sliced off

    # ---- parameters: lane-dense slabs; weight in bf16 -----------------------
    a2_2d = a2.reshape(1, Hp).astype(jnp.float32)
    b2_2d = b2.reshape(1, Hp).astype(jnp.float32)
    bias_2d = bias.reshape(1, Hp).astype(jnp.float32)
    w_bf16 = w.astype(jnp.bfloat16)

    needed = (2 * tm_eff * Hp * 4                  # x tiles (double-buffered)
              + 2 * tm_eff * tn * out_size         # out tiles (double-buffered)
              + fixed                              # weight + params
              + tm_eff * (Hp * 6 + tn * 4))        # f32/bf16 normed + y headroom
    vmem_limit = min(max(int(needed * 1.25), 32 * 1024 * 1024), vmem_cap)

    kernel = functools.partial(_sublayer_connection_kernel, eps=eps, h_true=H)
    param_mode = pl.Buffered(1)                    # grid-invariant: no second buffer
    w_mode = pl.Buffered(w_bufs)

    cost = pl.CostEstimate(
        flops=2 * r_pad * Hp * Hp + 8 * r_pad * Hp,
        transcendentals=2 * r_pad,                 # sqrt + reciprocal per row
        bytes_accessed=(r_pad * Hp * 4 + r_pad * Hp * out_size
                        + Hp * Hp * 2 + 3 * Hp * 4),
    )

    out2 = pl.pallas_call(
        kernel,
        out_shape=jax.ShapeDtypeStruct((r_pad, Hp), out_dtype),
        grid_spec=pltpu.PrefetchScalarGridSpec(
            num_scalar_prefetch=0,
            grid=(grid_m, grid_n),
            in_specs=[
                pl.BlockSpec((tm_eff, Hp), lambda i, j: (i, 0)),   # x rows (resident over j)
                pl.BlockSpec((1, Hp), lambda i, j: (0, 0), pipeline_mode=param_mode),  # a_2
                pl.BlockSpec((1, Hp), lambda i, j: (0, 0), pipeline_mode=param_mode),  # b_2
                pl.BlockSpec((Hp, tn), lambda i, j: (0, j), pipeline_mode=w_mode),     # W (bf16)
                pl.BlockSpec((1, tn), lambda i, j: (0, j), pipeline_mode=w_mode),      # bias
            ],
            out_specs=pl.BlockSpec((tm_eff, tn), lambda i, j: (i, j)),
        ),
        compiler_params=pltpu.CompilerParams(
            dimension_semantics=("parallel", "arbitrary"),
            vmem_limit_bytes=vmem_limit,
        ),
        cost_estimate=cost,
    )(x2, a2_2d, b2_2d, w_bf16, bias_2d)

    out2 = out2[:R, :H]
    return out2.reshape(B, S, H)


def _reference(x, a2, b2, w, bias, eps=1e-6):
    # Pure-JAX f32 reference mirroring the PyTorch forward (eval-mode dropout).
    mean = jnp.mean(x, axis=-1, keepdims=True)
    centered = x - mean
    h = x.shape[-1]
    std = jnp.sqrt(jnp.sum(centered * centered, axis=-1, keepdims=True) / (h - 1))
    normed = a2 * centered / (std + eps) + b2
    return x + normed @ w + bias


if __name__ == "__main__":
    key = jax.random.PRNGKey(0)
    B, S, H = 2, 8, 32  # batch, seq, hidden (size == H)

    k_x, k_w, k_b = jax.random.split(key, 3)
    x = jax.random.normal(k_x, (B, S, H), dtype=jnp.float32)

    # LayerNorm params exactly as in __init__: ones / zeros
    a2 = jnp.ones((H,), dtype=jnp.float32)
    b2 = jnp.zeros((H,), dtype=jnp.float32)

    # Deterministic synthetic sublayer (Linear H -> H)
    w = jax.random.normal(k_w, (H, H), dtype=jnp.float32) * (1.0 / jnp.sqrt(H))
    bias = jax.random.normal(k_b, (H,), dtype=jnp.float32) * 0.01

    out = sublayer_connection(x, a2, b2, w, bias)
    out = jax.block_until_ready(out)

    ref = _reference(x, a2, b2, w, bias)
    assert out.shape == (B, S, H)
    # Tolerance accounts for bf16 matmul operands (f32 accumulation) and the
    # approx EUP reciprocal vs. the full-f32 reference.
    assert jnp.allclose(out, ref, atol=2e-2, rtol=2e-2), "mismatch vs reference"

    # TODO(synk): dropout with p>0 in training mode would need pltpu.prng_random_bits;
    # eval-mode (identity) semantics are implemented here.
    print("KERNEL_OK")
</pallas_src>

<mosaic_0001>
module attributes {stable_mosaic.version = 11 : i64} {
  func.func @_sublayer_connection_kernel(%arg0: i32, %arg1: i32, %arg2: memref<8x128xf32, #tpu.memory_space<vmem>>, %arg3: memref<1x128xf32, #tpu.memory_space<vmem>>, %arg4: memref<1x128xf32, #tpu.memory_space<vmem>>, %arg5: memref<128x128xbf16, #tpu.memory_space<vmem>>, %arg6: memref<1x128xf32, #tpu.memory_space<vmem>>, %arg7: memref<8x128xf32, #tpu.memory_space<vmem>>) attributes {dimension_semantics = [#tpu.dimension_semantics<parallel>, #tpu.dimension_semantics<arbitrary>], iteration_bounds = array<i64: 2, 1>, scalar_prefetch = 0 : i64, scratch_operands = 0 : i64, tpu.core_type = #tpu.core_type<tc>, window_params = [{transform_indices = @transform_0, window_bounds = array<i64: 8, 128>}, {pipeline_mode = #tpu.pipeline_mode<synchronous>, transform_indices = @transform_1, window_bounds = array<i64: 1, 128>}, {pipeline_mode = #tpu.pipeline_mode<synchronous>, transform_indices = @transform_2, window_bounds = array<i64: 1, 128>}, {pipeline_mode = #tpu.pipeline_mode<synchronous>, transform_indices = @transform_3, window_bounds = array<i64: 128, 128>}, {pipeline_mode = #tpu.pipeline_mode<synchronous>, transform_indices = @transform_4, window_bounds = array<i64: 1, 128>}, {transform_indices = @transform_5, window_bounds = array<i64: 8, 128>}]} {
    %c0 = arith.constant 0 : index
    %c0_0 = arith.constant 0 : index
    %0 = vector.load %arg2[%c0, %c0_0] : memref<8x128xf32, #tpu.memory_space<vmem>>, vector<8x128xf32>
    %cst = arith.constant dense<0.000000e+00> : vector<8xf32>
    %1 = vector.multi_reduction <add>, %0, %cst [1] : vector<8x128xf32> to vector<8xf32>
    %2 = vector.shape_cast %1 : vector<8xf32> to vector<8x1xf32>
    %cst_1 = arith.constant 3.125000e-02 : f32
    %3 = vector.broadcast %cst_1 : f32 to vector<8x1xf32>
    %4 = arith.mulf %2, %3 : vector<8x1xf32>
    %5 = arith.mulf %0, %0 : vector<8x128xf32>
    %cst_2 = arith.constant dense<0.000000e+00> : vector<8xf32>
    %6 = vector.multi_reduction <add>, %5, %cst_2 [1] : vector<8x128xf32> to vector<8xf32>
    %7 = vector.shape_cast %6 : vector<8xf32> to vector<8x1xf32>
    %cst_3 = arith.constant 3.200000e+01 : f32
    %8 = vector.broadcast %cst_3 : f32 to vector<8x1xf32>
    %9 = arith.mulf %8, %4 : vector<8x1xf32>
    %10 = arith.mulf %9, %4 : vector<8x1xf32>
    %11 = arith.subf %7, %10 : vector<8x1xf32>
    %cst_4 = arith.constant 0.0322580636 : f32
    %12 = vector.broadcast %cst_4 : f32 to vector<8x1xf32>
    %13 = arith.mulf %11, %12 : vector<8x1xf32>
    %cst_5 = arith.constant 0.000000e+00 : f32
    %14 = vector.broadcast %cst_5 : f32 to vector<8x1xf32>
    %15 = arith.maximumf %13, %14 : vector<8x1xf32>
    %16 = math.sqrt %15 : vector<8x1xf32>
    %cst_6 = arith.constant 9.99999997E-7 : f32
    %17 = vector.broadcast %cst_6 : f32 to vector<8x1xf32>
    %18 = arith.addf %16, %17 : vector<8x1xf32>
    %19 = tpu.reciprocal %18 {approx = true} : vector<8x1xf32> -> vector<8x1xf32>
    %c0_7 = arith.constant 0 : index
    %c0_8 = arith.constant 0 : index
    %20 = vector.load %arg3[%c0_7, %c0_8] : memref<1x128xf32, #tpu.memory_space<vmem>>, vector<1x128xf32>
    %21 = vector.broadcast %4 : vector<8x1xf32> to vector<8x128xf32>
    %22 = arith.subf %0, %21 : vector<8x128xf32>
    %23 = vector.broadcast %19 : vector<8x1xf32> to vector<8x128xf32>
    %24 = arith.mulf %22, %23 : vector<8x128xf32>
    %25 = vector.broadcast %20 : vector<1x128xf32> to vector<8x128xf32>
    %26 = arith.mulf %25, %24 : vector<8x128xf32>
    %c0_9 = arith.constant 0 : index
    %c0_10 = arith.constant 0 : index
    %27 = vector.load %arg4[%c0_9, %c0_10] : memref<1x128xf32, #tpu.memory_space<vmem>>, vector<1x128xf32>
    %28 = vector.broadcast %27 : vector<1x128xf32> to vector<8x128xf32>
    %29 = arith.addf %26, %28 : vector<8x128xf32>
    %30 = arith.truncf %29 : vector<8x128xf32> to vector<8x128xbf16>
    %c0_11 = arith.constant 0 : index
    %c0_12 = arith.constant 0 : index
    %31 = vector.load %arg5[%c0_11, %c0_12] : memref<128x128xbf16, #tpu.memory_space<vmem>>, vector<128x128xbf16>
    %cst_13 = arith.constant dense<0.000000e+00> : vector<8x128xf32>
    %32 = tpu.matmul %30, %31, %cst_13 {dimension_numbers = #tpu.dot_dimension_numbers<[1], [0], [0], [1], [0, 0, 1, 1], [], []>} : vector<8x128xbf16>, vector<128x128xbf16>, vector<8x128xf32> -> vector<8x128xf32>
    %c0_14 = arith.constant 0 : index
    %c0_15 = arith.constant 0 : index
    %33 = vector.load %arg6[%c0_14, %c0_15] : memref<1x128xf32, #tpu.memory_space<vmem>>, vector<1x128xf32>
    %34 = vector.broadcast %33 : vector<1x128xf32> to vector<8x128xf32>
    %35 = arith.addf %32, %34 : vector<8x128xf32>
    %36 = arith.addf %0, %35 : vector<8x128xf32>
    %c0_16 = arith.constant 0 : index
    %c0_17 = arith.constant 0 : index
    %37 = vector.load %arg7[%c0_16, %c0_17] : memref<8x128xf32, #tpu.memory_space<vmem>>, vector<8x128xf32>
    tpu.vector_store %arg7[%c0_16, %c0_17], %36 {strides = array<i32>} : memref<8x128xf32, #tpu.memory_space<vmem>>, vector<8x128xf32>,
    return
  }
  func.func @transform_0(%arg0: i32, %arg1: i32) -> (i32, i32) {
    %c0_i32 = arith.constant 0 : i32
    %c0_i32_0 = arith.constant 0 : i32
    return %arg0, %c0_i32 : i32, i32
  }
  func.func @transform_1(%arg0: i32, %arg1: i32) -> (i32, i32) {
    %c0_i32 = arith.constant 0 : i32
    %c0_i32_0 = arith.constant 0 : i32
    %c0_i32_1 = arith.constant 0 : i32
    return %c0_i32, %c0_i32_0 : i32, i32
  }
  func.func @transform_2(%arg0: i32, %arg1: i32) -> (i32, i32) {
    %c0_i32 = arith.constant 0 : i32
    %c0_i32_0 = arith.constant 0 : i32
    %c0_i32_1 = arith.constant 0 : i32
    return %c0_i32, %c0_i32_0 : i32, i32
  }
  func.func @transform_3(%arg0: i32, %arg1: i32) -> (i32, i32) {
    %c0_i32 = arith.constant 0 : i32
    %c0_i32_0 = arith.constant 0 : i32
    return %c0_i32, %arg1 : i32, i32
  }
  func.func @transform_4(%arg0: i32, %arg1: i32) -> (i32, i32) {
    %c0_i32 = arith.constant 0 : i32
    %c0_i32_0 = arith.constant 0 : i32
    return %c0_i32, %arg1 : i32, i32
  }
  func.func @transform_5(%arg0: i32, %arg1: i32) -> (i32, i32) {
    %c0_i32 = arith.constant 0 : i32
    return %arg0, %arg1 : i32, i32
  }
}

</mosaic_0001>

<bundles_post_ra>
// kernel: tpu_custom_call.1
= control target key start
LH: loop header
LB: loop body
LE: loop exit
PB: predicated region body
PF: predicated region fallthrough
CT: control target
= control target key end

     0   :  { %10 = vsyncpa [#allocation3], 0  ;;  %s1077_s0 = inlined_call_operand.hbm [shape: f32[16,128], index: 0, kind: input, shape index: {}]   ;;  %s1078_s1 = inlined_call_operand.hbm [shape: f32[1,128], index: 1, kind: input, shape index: {}]   ;;  %s1079_s2 = inlined_call_operand.vmem [shape: f32[1,128], index: 2, kind: input, shape index: {}]   ;;  %s1080_s3 = inlined_call_operand.hbm [shape: bf16[128,128], index: 3, kind: input, shape index: {}]   ;;  %s1081_s4 = inlined_call_operand.vmem [shape: f32[1,128], index: 4, kind: input, shape index: {}]   ;;  %s1082_s5 = inlined_call_operand.hbm [shape: f32[16,128], index: 5, kind: output, shape index: {}]  }
   0x1   :  { %12 = vsyncpa [#allocation3 + $0x1], 0 }
   0x2   :  { %13 = vsyncpa [#allocation6], 0 }
   0x3   :  { %14 = vsyncpa [#allocation4], 0 }
   0x4   :  { %16 = vsyncpa [#allocation4 + $0x1], 0  ;;  %s921_s18 = smov 0   ;;  %s923_s19 = smov 0  }
   0x5   :  { %s925_s20 = smov 0   ;;  %s927_s21 = smov 0  }
   0x6   :  { %s929_s22 = smov 0   ;;  %s931_s23 = smov 0  }
   0x7 LB: > { %s559_s24 = sadd.s32 4294967295, %s885_s23   ;;  %s560_s25 = sadd.s32 4294967294, %s885_s23   ;;  %s885_s23 = sphi %s931_s23, %s22_s23   ;;  %s881_s22 = sphi %s929_s22, %s1092_s22   ;;  %s877_s21 = sphi %s927_s21, %s1091_s21   ;;  %s873_s20 = sphi %s925_s20, %s1090_s20   ;;  %s869_s19 = sphi %s923_s19, %s1089_s19   ;;  %s865_s18 = sphi %s921_s18, %s1088_s18  }
   0x8   : > { %p54_p0 = scmp.ne.s32.totalorder %s869_s19, %s865_s18  ;;  %p957_p1 = scmp.eq.s32.totalorder %s559_s24, 0 }
   0x9   : > { %p180_p2 = scmp.eq.s32.totalorder %s560_s25, 1  ;;  %p561_p4 = scmp.ge.s32.totalorder %s885_s23, 1 }
   0xa   : > { %p963_p3 = por %p957_p1, %p54_p0  ;;  %p187_p6 = scmp.lt.s32.totalorder %s885_s23, 3 }
   0xb   : > { %p968_p5 = por %p180_p2, %p54_p0  ;;  %s199_s6 = sshll.u32 %s1078_s1, 4  ;;  %s200_s6 = int_to_ptr.hbm [resolvable:$true] %s199_s6 }
   0xc   : > { %p976_p7 = pnand %p561_p4, %p187_p6  ;;  %p565_p8 = scmp.ge.s32.totalorder %s885_s23, 2 }
   0xd   : > { %s887_s8 = smov [#allocation5]   ;;  %s215_s12 = sshll.u32 %s1080_s3, 4  ;;  %s216_s12 = int_to_ptr.hbm [resolvable:$true] %s215_s12 }
   0xe   : > { %p629_p9 = pneg %p976_p7  ;;  %s201_s9 = sshll.u32 %s887_s8, 4  ;;  %s202_s9 = int_to_ptr.vmem [resolvable:$true] %s201_s9 }
   0xf   : > { %s888_s13 = smov [#allocation7]   ;;  %s889_s15 = smov 64  }
  0x10   : > { %p630_p10 = pnand %p629_p9, %p957_p1  ;;  %s217_s14 = sshll.u32 %s888_s13, 4  ;;  %s218_s14 = int_to_ptr.vmem [resolvable:$true] %s217_s14 }
  0x11   : > { %s890_s16 = smov 4   ;;  %p174_p11 = scmp.eq.s32.totalorder %s559_s24, 1 }
  0x12   : > { %632 = dma.hbm_to_vmem [thread:$0]  (!%p630_p10), %s200_s6, 16, %s202_s9, [#allocation6]  }
  0x13   : > { %635 = dma.hbm_to_vmem [thread:$0]  (!%p630_p10), %s216_s12, 1024, %s218_s14, [#allocation6], %s889_s15, %s889_s15, %s890_s16  }
  0x14   : > { %s34_s17 = sadd.s32 1, %s881_s22  ;;  %s41_s25 = sadd.s32 1, %s873_s20 }
  0x15   : > { %p36_p12 = scmp.ge.s32.totalorder %s34_s17, 2  ;;  %p48_p13 = scmp.ne.s32.totalorder %s873_s20, %s869_s19 }
  0x16   : > { %p49_p0 = scmp.eq.s32.totalorder %s885_s23, 0  ;;  %p646_p4 = scmp.lt.s32.totalorder %s885_s23, 2 }
  0x17   : > { %s1094_s17 = smov (%p36_p12, %s34_s17), 0  ;;  %p997_p2 = por %p174_p11, %p48_p13 }
  0x18   : > { %s38_s30 = ssub.s32 %s881_s22, %s1094_s17  ;;  %s237_s6 = sand.u32 1, %s873_s20  }
  0x19   : > { %p39_p6 = scmp.eq.s32.totalorder %s38_s30, 0  ;;  %p50_p9 = por %p49_p0, %p48_p13 }
  0x1a   : > { %s566_s8 = sshll.u32 %s237_s6, 3  ;;  %s567_s24 = sshll.u32 %s881_s22, 3 }
  0x1b   : > { %s1007_s9 = scalar_select %p39_p6, %s873_s20, %s41_s25  }
  0x1c   : > { %s245_s12 = scalar_lea.hbm %s1077_s0, %s567_s24  ;;  %s241_s14 = scalar_lea.vmem [#allocation2], %s566_s8 }
  0x1d   : > { %s247_s13 = sshll.u32 %s245_s12, 4  ;;  %s249_s15 = sshll.u32 %s241_s14, 4  ;;  %s248_s13 = int_to_ptr.hbm [resolvable:$true] %s247_s13  ;;  %s250_s15 = int_to_ptr.vmem [resolvable:$true] %s249_s15 }
  0x1e   : > { %p637_p10 = pnand %p646_p4, %p50_p9  ;;  %s238_s16 = scalar_lea.sflag [#allocation3], %s237_s6 }
  0x1f   : > { %258 = sbr.rel (%p976_p7) target bundleno = 342 (0x156), region = 40  ;;  %s1017_s25 = sand.u32 (!%p976_p7), 1, %s869_s19  }
  0x20   : > { %639 = dma.hbm_to_vmem [thread:$0]  (!%p637_p10), %s248_s13, 128, %s250_s15, %s238_s16  }
  0x21   : > { %s569_s30 = sshll.u32 (!%p976_p7), %s1017_s25, 3  ;;  %s261_s24 = scalar_lea.sflag (!%p976_p7), [#allocation3], %s1017_s25 }
  0x22   : > { %s264_s8 = scalar_lea.vmem (!%p976_p7), [#allocation2], %s569_s30 }
  0x24   : > { %852 = dma.done.wait (%p963_p3), %s261_s24, 128  }
  0x25   : > { %854 = vsyncadd (%p963_p3), %s261_s24, 4294967168 }
  0x26   : > { %856 = dma.done.wait (%p957_p1), [#allocation6], 1040  }
  0x27   : > { %858 = vsyncadd (%p957_p1), [#allocation6], 4294966256  ;;  %v308_v0 = vld [vmem:[%s264_s8] sm:$0xff]  ;;  %v613_v5 = vld [vmem:[#allocation7 + $0x20] sm:$0xff]  ;;  %s606_s7 = sshll.u32 %s877_s21, 3  ;;  %s304_s14 = scalar_lea.vmem [#allocation8], %s569_s30 }
  0x28   : > { %309 = vadd.xlane.f32.xlu0 %v308_v0  ;;  %v312_v1 = vmul.f32 %v308_v0, %v308_v0  ;;  %v616_v2 = vld [vmem:[#allocation7 + $0x38] sm:$0xff]  ;;  %v615_v3 = vld [vmem:[#allocation7 + $0x30] sm:$0xff]  ;;  %v614_v4 = vld [vmem:[#allocation7 + $0x28] sm:$0xff]  ;;  %s442_s13 = scalar_lea.hbm %s1082_s5, %s606_s7  ;;  %s444_s15 = sshll.u32 %s304_s14, 4  ;;  %s445_s15 = int_to_ptr.vmem [resolvable:$true] %s444_s15 }
  0x29   : > { %415 = vmatpush.bf16.msra.mxu0 %v616_v2  ;;  %v612_v8 = vld [vmem:[#allocation7 + $0x18] sm:$0xff]  ;;  %v611_v10 = vld [vmem:[#allocation7 + $0x10] sm:$0xff]  ;;  %v610_v14 = vld [vmem:[#allocation7 + $0x8] sm:$0xff]  ;;  %s446_s16 = sshll.u32 %s442_s13, 4  ;;  %s431_s21 = scalar_lea.sflag [#allocation4], %s1017_s25  ;;  %s447_s16 = int_to_ptr.hbm [resolvable:$true] %s446_s16 }
  0x2a   : > { %v609_v17 = vld [vmem:[#allocation7] sm:$0xff]  ;;  %v702_v30 = vld [vmem:[#allocation5] ss:$0 sm:$0xff]  ;;  %v703_v33 = vld [vmem:[%s1079_s2] ss:$0 sm:$0xff]  ;;  %s813_s24 = sshra.s32 %s447_s16, 4  ;;  %s814_s24 = int_to_ptr.hbm [resolvable:$true] %s813_s24 }
  0x2b   : > { %v704_v37 = vld [vmem:[%s1081_s4] ss:$0 sm:$0xff]  ;;  %s815_s8 = scalar_lea.hbm %s814_s24, 8  ;;  %s819_s7 = scalar_lea.hbm %s1082_s5, 16 }
  0x2c   : > { %p816_p1 = scmp.ne.s32.totalorder %s814_s24, %s815_s8  ;;  %p820_p11 = scmp.lt.s32.totalorder %s814_s24, %s1082_s5 }
  0x2d   : > { %416 = vmatpush.bf16.msra.mxu0 %v615_v3  ;;  %p821_p12 = scmp.lt.s32.totalorder %s819_s7, %s815_s8 }
  0x2e   : > { %p817_p3 = pnand %p816_p1, %p997_p2 }
  0x2f   : > { %p822_p13 = por %p821_p12, %p820_p11 }
  0x30   : > { %313 = vadd.xlane.f32.xlu0 %v312_v1  ;;  %p818_p7 = pneg %p817_p3 }
  0x31   : > { %417 = vmatpush.bf16.msra.mxu0 %v614_v4 }
  0x32   : > { %p823_p0 = pnand %p822_p13, %p818_p7 }
  0x35   : > { %418 = vmatpush.bf16.msra.mxu0 %v613_v5 }
  0x39   : > { %419 = vmatpush.bf16.msra.mxu0 %v612_v8 }
  0x3d   : > { %420 = vmatpush.bf16.msra.mxu0 %v611_v10 }
  0x41   : > { %421 = vmatpush.bf16.msra.mxu0 %v610_v14 }
  0x45   : > { %422 = vmatpush.bf16.msra.mxu0 %v609_v17 }
  0x9b   : > { %v310_v6 = vpop.xlane.xlu0 %309 }
  0x9c   : > { %v311_v7 = vmul.f32 0.03125, %v310_v6 }
  0x9e   : > { %v315_v9 = vmul.f32 32.0, %v311_v7  ;;  %v335_v29 = vsub.f32 %v308_v0, %v311_v7 }
  0xa0   : > { %v316_v11 = vmul.f32 %v315_v9, %v311_v7 }
  0xa3   : > { %v314_v12 = vpop.xlane.xlu0 %313 }
  0xa4   : > { %v317_v13 = vsub.f32 %v314_v12, %v316_v11 }
  0xa6   : > { %v318_v15 = vmul.f32 0.032258064, %v317_v13 }
  0xa8   : > { %v319_v16 = vmax.f32 %v318_v15, 0.0 }
  0xaa   : > { %705 = vrsqrt.f32 %v319_v16  ;;  %vm327_vm0 = vcmp.eq.f32.partialorder %v319_v16, inf  ;;  %v330_v25 = vand.u32 2147483648, %v319_v16  ;;  %vm329_vm1 = vcmp.eq.f32.partialorder %v319_v16, 0.0 }
  0xb0   : > { %v706_v18 = vpop.eup %705 }
  0xb1   : > { %v321_v19 = vmul.f32 %v706_v18, %v319_v16 }
  0xb3   : > { %v322_v20 = vmul.f32 %v706_v18, %v321_v19 }
  0xb5   : > { %v323_v21 = vmul.f32 0.5, %v322_v20 }
  0xb7   : > { %v324_v22 = vsub.f32 1.5, %v323_v21 }
  0xb9   : > { %v325_v23 = vmul.f32 %v706_v18, %v324_v22 }
  0xbb   : > { %v326_v24 = vmul.f32 %v325_v23, %v319_v16 }
  0xbd   : > { %v328_v26 = vsel %vm327_vm0, %v319_v16, %v326_v24 }
  0xbe   : > { %v331_v27 = vsel %vm329_vm1, %v330_v25, %v328_v26 }
  0xbf   : > { %v332_v28 = vadd.f32 1e-06, %v331_v27 }
  0xc1   : > { %707 = vrcp.f32 %v332_v28 }
  0xc7   : > { %v708_v31 = vpop.eup %707 }
  0xc8   : > { %v336_v32 = vmul.f32 %v708_v31, %v335_v29 }
  0xca   : > { %v340_v34 = vmul.f32 %v702_v30, %v336_v32 }
  0xcc   : > { %v345_v35 = vadd.f32 %v703_v33, %v340_v34 }
  0xce   : > { %v346_v36 = vpack.c.bf16 %v345_v35, %v345_v35 }
  0xd0   : > { %423 = vmatmul.bf16.vlgmr.msra.gmra.mxu0 %v346_v36 }
 0x14d   : > { %v424_v38 = vpop.f32.mrf.mxu0 }
 0x14e   : > { %v425_v39 = vadd.f32 %v704_v37, %v424_v38 }
 0x150   : > { %v428_v40 = vadd.f32 %v425_v39, %v308_v0 }
 0x152   : > { %429 = vst [vmem:[%s304_s14] sm:$0xff] %v428_v40 }
 0x153   : > { %826 = shalt.err (!%p823_p0)
}
 0x154   : > { %627 = dma.vmem_to_hbm [thread:$0]  (%p997_p2), %s445_s15, 128, %s447_s16, %s431_s21  }
 0x155   : > { %v426_v41 = vpop.f32.mrf.mxu0 }
 0x156 PF: > { %s458_s25 = sand.u32 1, %s865_s18   ;;  %p641_p4 = pnand %p565_p8, %p968_p5 }
 0x157   : > { %s459_s10 = scalar_lea.sflag [#allocation4], %s458_s25 }
 0x158   : > { %p642_p6 = pneg %p641_p4 }
 0x15a   : > { %860 = dma.done.wait (%p642_p6), %s459_s10, 128  }
 0x15b   : > { %862 = vsyncadd (%p642_p6), %s459_s10, 4294967168  ;;  %s22_s23 = sadd.s32 1, %s885_s23   ;;  %s1088_s18 = smov %s869_s19 }
 0x15c   : > { %p19_p9 = scmp.ge.s32.totalorder %s22_s23, 4   ;;  %s1089_s19 = smov %s873_s20 }
 0x15d   : > { %s1090_s20 = smov %s1007_s9  ;;  %s1091_s21 = smov %s881_s22 }
 0x15e   : > { %s1092_s22 = smov %s1094_s17  ;;  %21 = sbr.rel (!%p19_p9) target bundleno = 7 (0x7), region = 97 }
 0x163   :  { %465 = vsyncpa [#allocation3], 1 }
 0x164   :  { %467 = vsyncpa [#allocation3 + $0x1], 1 }
 0x165   :  { %468 = vsyncpa [#allocation6], 1 }
 0x166   :  { %469 = vsyncpa [#allocation4], 1 }
 0x167   :  { %471 = vsyncpa [#allocation4 + $0x1], 1 }

</bundles_post_ra>
